<compile_context>
chip_gen: v6e
topology: v6e:2x2x1
jax: 0.10.0
libtpu: 0.0.40
codegen_flags: <defaults>
</compile_context>

<pallas_src>
import functools
import math

import jax
import jax.numpy as jnp
from jax import lax
from jax.experimental import pallas as pl
from jax.experimental.pallas import tpu as pltpu

BN_EPS = 1e-5


# ---------------------------------------------------------------------------
# Fused kernel: spatial MLP (BN1 folded) + BN2 affine + 2 temporal convs with
# the refine Linear folded into the second one.  Layout: (channels, lanes),
# lanes = flattened (batch, time, vertex) -> every matmul and the final store
# are lane-dense.
# ---------------------------------------------------------------------------
def stgcn_fused_kernel(x_ref, w1t_ref, b1_ref, w2t_ref, b2_ref, bn2_ref,
                       wt1p_ref, wt1m_ref, wt1n_ref, bt1_ref,
                       wfp_ref, wfm_ref, wfn_ref, bf_ref,
                       o_ref, *, V, TV):
    N = x_ref.shape[-1]
    cd = w2t_ref.dtype                       # MXU-operand compute dtype
    f32 = jnp.float32

    # Boundary masks, computed once as (1, N) and reused by both temporal convs.
    # Position of each lane inside its own T*V block (tiles are whole T*V blocks,
    # so local lane index mod TV == position within the batch element).
    pos = lax.broadcasted_iota(jnp.int32, (1, N), 1) % TV
    mask_prev = pos >= V                     # a (t-1) neighbour exists
    mask_next = pos < TV - V                 # a (t+1) neighbour exists

    def shift_prev(a):                       # a[:, n] <- a[:, n - V]; zero at t == 0
        return jnp.where(mask_prev, pltpu.roll(a, V, 1), jnp.zeros((), a.dtype))

    def shift_next(a):                       # a[:, n] <- a[:, n + V]; zero at t == T-1
        return jnp.where(mask_next, pltpu.roll(a, N - V, 1), jnp.zeros((), a.dtype))

    x = x_ref[...]                                                       # (C, N)

    # spatial_conv1 + ReLU   (K = C is tiny; MXU has slack so a dot is fine)
    h1 = jnp.dot(w1t_ref[...], x, preferred_element_type=f32) + b1_ref[...]
    h1 = jnp.maximum(h1, 0.0)                                            # (H, N) f32

    # spatial_conv2 (BN1 folded into weights/bias) + ReLU, then BN2 as affine
    h2 = jnp.dot(w2t_ref[...], h1.astype(cd), preferred_element_type=f32) + b2_ref[...]
    h2 = jnp.maximum(h2, 0.0)
    z = h2 * bn2_ref[:, 0:1] + bn2_ref[:, 1:2]                           # (H, N) f32

    # temporal conv 1: three accumulating dots (no (3H, N) concat materialized)
    y1 = jnp.dot(wt1m_ref[...], z.astype(cd), preferred_element_type=f32)
    y1 = y1 + jnp.dot(wt1p_ref[...], shift_prev(z).astype(cd),
                      preferred_element_type=f32)
    y1 = y1 + jnp.dot(wt1n_ref[...], shift_next(z).astype(cd),
                      preferred_element_type=f32)
    y1 = y1 + bt1_ref[...]                                               # (H, N) f32

    # temporal conv 2 with the refine Linear folded in -> output directly in
    # (C, N) channels-first layout (lane-dense store, already NCHW order)
    out = jnp.dot(wfm_ref[...], y1.astype(cd), preferred_element_type=f32)
    out = out + jnp.dot(wfp_ref[...], shift_prev(y1).astype(cd),
                        preferred_element_type=f32)
    out = out + jnp.dot(wfn_ref[...], shift_next(y1).astype(cd),
                        preferred_element_type=f32)
    out = out + bf_ref[...]
    o_ref[...] = out.astype(o_ref.dtype)


# ---------------------------------------------------------------------------
# One-time parameter prep (hoisted out of the per-call path): softmax(A),
# eval-mode BN folding, per-tap weight re-layout, refine-into-conv2 fusion.
# ---------------------------------------------------------------------------
def prepare_params(p, *, compute_dtype=jnp.float32):
    f32 = jnp.float32
    C, H = p["W1"].shape
    cd = compute_dtype

    def bn_affine(bn):
        g, beta, mean, var = bn[0], bn[1], bn[2], bn[3]
        s = g * lax.rsqrt(var + BN_EPS)
        return s, beta - mean * s

    s1, t1 = bn_affine(p["bn1"].astype(f32))
    s2, t2 = bn_affine(p["bn2"].astype(f32))

    w1t = p["W1"].T.astype(cd)                                    # (H, C)
    b1 = p["b1"].reshape(H, 1).astype(f32)

    # fold BN1 into spatial_conv2 (exact: no padding/nonlinearity in between)
    w2t = (s1[:, None] * p["W2"]).T.astype(cd)                    # (H, H)
    b2 = (p["b2"].reshape(-1) + t1 @ p["W2"]).reshape(H, 1).astype(f32)
    bn2 = jnp.stack([s2, t2], axis=1).astype(f32)                 # (H, 2): scale, shift

    # temporal conv 1: per-tap (out, in) weights; taps 0=prev(t-1), 1=mid, 2=next(t+1)
    wt1p, wt1m, wt1n = (p["Wt1"][k].T.astype(cd) for k in range(3))
    bt1 = p["bt1"].reshape(H, 1).astype(f32)

    # temporal conv 2 with the refine Linear folded in:
    #   Wf[k] = Wr^T @ Wt2[k]^T  (C, H);   bf = Wr^T @ bt2 + br  (C, 1)
    wrt = p["Wr"].T.astype(f32)                                   # (C, H)
    wfp, wfm, wfn = ((wrt @ p["Wt2"][k].T).astype(cd) for k in range(3))
    bf = (wrt @ p["bt2"].reshape(H, 1) + p["br"].reshape(C, 1)).astype(f32)

    return {
        "A": jax.nn.softmax(p["A"].astype(f32), axis=-1),
        "w1t": w1t, "b1": b1, "w2t": w2t, "b2": b2, "bn2": bn2,
        "wt1p": wt1p, "wt1m": wt1m, "wt1n": wt1n, "bt1": bt1,
        "wfp": wfp, "wfm": wfm, "wfn": wfn, "bf": bf,
    }


# ---------------------------------------------------------------------------
# Per-call wrapper: graph-mix einsum (tiny, one fused XLA op) + pallas_call.
# ---------------------------------------------------------------------------
def stgcn_forward(x, prep, *, lane_tile=2048):
    B, C, T, V = x.shape
    TV = T * V
    n_lane = B * TV
    f32 = jnp.float32
    cd = prep["w2t"].dtype

    # graph mixing: (V, V) matmul over C channels, emitted channels-first with
    # the batch flattened into the lane axis (softmax(A) precomputed in prep).
    xa = jnp.einsum("bctw,wv->cbtv", x.astype(f32), prep["A"])
    xa = xa.reshape(C, n_lane).astype(cd)

    # lane-tile sizing: whole T*V blocks per tile; keep >= 2 grid steps when
    # possible so both of v7x's TensorCores get work (no-op on v5e/v6e).
    n_blocks = n_lane // TV
    tile_blocks = min(max(1, lane_tile // TV), n_blocks)
    if n_blocks >= 2 and tile_blocks == n_blocks:
        tile_blocks = (n_blocks + 1) // 2
    tile_n = tile_blocks * TV
    # lane blocks must be 128-aligned unless a single tile covers the full axis
    if tile_n % 128 != 0 and tile_blocks < n_blocks:
        step = 128 // math.gcd(TV, 128)
        tile_blocks = min(n_blocks, ((tile_blocks + step - 1) // step) * step)
        tile_n = tile_blocks * TV
    num_tiles = (n_blocks + tile_blocks - 1) // tile_blocks

    def const(arr):
        shape = arr.shape
        return pl.BlockSpec(shape, lambda i: (0,) * len(shape))

    kernel = functools.partial(stgcn_fused_kernel, V=V, TV=TV)

    out = pl.pallas_call(
        kernel,
        out_shape=jax.ShapeDtypeStruct((C, n_lane), f32),
        grid=(num_tiles,),
        in_specs=[
            pl.BlockSpec((C, tile_n), lambda i: (0, i)),          # xa lane tile
            const(prep["w1t"]), const(prep["b1"]),                # W1^T, b1
            const(prep["w2t"]), const(prep["b2"]), const(prep["bn2"]),
            const(prep["wt1p"]), const(prep["wt1m"]), const(prep["wt1n"]),
            const(prep["bt1"]),
            const(prep["wfp"]), const(prep["wfm"]), const(prep["wfn"]),
            const(prep["bf"]),
        ],
        out_specs=pl.BlockSpec((C, tile_n), lambda i: (0, i)),
        compiler_params=pltpu.CompilerParams(
            dimension_semantics=("parallel",)),
    )(xa, prep["w1t"], prep["b1"], prep["w2t"], prep["b2"], prep["bn2"],
      prep["wt1p"], prep["wt1m"], prep["wt1n"], prep["bt1"],
      prep["wfp"], prep["wfm"], prep["wfn"], prep["bf"])

    # (C, B*T*V) -> (B, C, T, V): one tiny transpose of the final result
    return jnp.transpose(out.reshape(C, B, T, V), (1, 0, 2, 3))


# ---------------------------------------------------------------------------
# Pure-JAX reference (mirrors the PyTorch forward, eval mode)
# ---------------------------------------------------------------------------
def reference(x, p):
    B, C, T, V = x.shape
    A = jax.nn.softmax(p["A"], axis=-1)
    h = jnp.einsum("bctv,vw->btcw", x, A)
    h = jnp.transpose(h, (0, 1, 3, 2))                           # (B,T,V,C)

    def bn(z, bnp):
        g, b, m, v = bnp[0], bnp[1], bnp[2], bnp[3]
        return (z - m) / jnp.sqrt(v + BN_EPS) * g + b

    h = bn(jax.nn.relu(h @ p["W1"] + p["b1"][0]), p["bn1"])
    h = bn(jax.nn.relu(h @ p["W2"] + p["b2"][0]), p["bn2"])

    hc = jnp.transpose(h, (0, 3, 1, 2))                          # (B,H,T,V)

    def tconv(z, Wt, bt):
        zpad = jnp.pad(z, ((0, 0), (0, 0), (1, 1), (0, 0)))
        out = sum(jnp.einsum("bitv,io->botv", zpad[:, :, k:k + T, :], Wt[k])
                  for k in range(3))
        return out + bt[0][None, :, None, None]

    hc = tconv(hc, p["Wt1"], p["bt1"])
    hc = tconv(hc, p["Wt2"], p["bt2"])

    h = jnp.transpose(hc, (0, 2, 3, 1))                          # (B,T,V,H)
    h = h @ p["Wr"] + p["br"][0]
    return jnp.transpose(h, (0, 3, 1, 2))                        # (B,C,T,V)


# ---------------------------------------------------------------------------
def init_params(key, C, V, H):
    ks = jax.random.split(key, 14)
    f32 = jnp.float32

    def bn_params(k):
        k1, k2, k3, k4 = jax.random.split(k, 4)
        return jnp.stack([
            1.0 + 0.1 * jax.random.normal(k1, (H,), f32),        # gamma
            0.1 * jax.random.normal(k2, (H,), f32),              # beta
            0.1 * jax.random.normal(k3, (H,), f32),              # running mean
            1.0 + 0.1 * jax.random.uniform(k4, (H,), f32),       # running var
        ])

    return {
        "A":   jnp.eye(V, dtype=f32) + 0.01 * jax.random.normal(ks[0], (V, V), f32),
        "W1":  0.1 * jax.random.normal(ks[1], (C, H), f32),
        "b1":  0.01 * jax.random.normal(ks[2], (1, H), f32),
        "bn1": bn_params(ks[11]),
        "W2":  0.1 * jax.random.normal(ks[3], (H, H), f32),
        "b2":  0.01 * jax.random.normal(ks[4], (1, H), f32),
        "bn2": bn_params(ks[12]),
        "Wt1": 0.1 * jax.random.normal(ks[5], (3, H, H), f32),   # [tap, in, out]
        "bt1": 0.01 * jax.random.normal(ks[6], (1, H), f32),
        "Wt2": 0.1 * jax.random.normal(ks[7], (3, H, H), f32),
        "bt2": 0.01 * jax.random.normal(ks[8], (1, H), f32),
        "Wr":  0.1 * jax.random.normal(ks[9], (H, C), f32),
        "br":  0.01 * jax.random.normal(ks[10], (1, C), f32),
    }


if __name__ == "__main__":
    B, C, T, V, H = 2, 3, 8, 16, 32
    key = jax.random.PRNGKey(0)
    kx, kp = jax.random.split(key)
    x = jax.random.normal(kx, (B, C, T, V), dtype=jnp.float32)
    params = init_params(kp, C, V, H)

    ref = reference(x, params)
    fwd = jax.jit(functools.partial(stgcn_forward, lane_tile=2048))

    # f32 path: tight correctness check (exercises a 2-step lane-tile grid here)
    prep_f32 = prepare_params(params, compute_dtype=jnp.float32)
    out_f32 = jax.block_until_ready(fwd(x, prep_f32))
    assert out_f32.shape == (B, C, T, V), out_f32.shape
    err_f32 = float(jnp.max(jnp.abs(out_f32 - ref)))
    assert err_f32 < 1e-4, f"f32 max abs error {err_f32}"

    # bf16 MXU-operand path (activations stay f32 between layers, so it is also
    # the recommended recipe on v5e): loose sanity check
    prep_bf16 = prepare_params(params, compute_dtype=jnp.bfloat16)
    out_bf16 = jax.block_until_ready(fwd(x, prep_bf16))
    err_bf16 = float(jnp.max(jnp.abs(out_bf16 - ref)))
    assert err_bf16 < 2e-2, f"bf16 max abs error {err_bf16}"

    print("KERNEL_OK")
</pallas_src>

<mosaic_0001>
module attributes {stable_mosaic.version = 11 : i64} {
  func.func @stgcn_fused_kernel(%arg0: i32, %arg1: memref<3x128xf32, #tpu.memory_space<vmem>>, %arg2: memref<32x3xf32, #tpu.memory_space<vmem>>, %arg3: memref<32x1xf32, #tpu.memory_space<vmem>>, %arg4: memref<32x32xf32, #tpu.memory_space<vmem>>, %arg5: memref<32x1xf32, #tpu.memory_space<vmem>>, %arg6: memref<32x2xf32, #tpu.memory_space<vmem>>, %arg7: memref<32x32xf32, #tpu.memory_space<vmem>>, %arg8: memref<32x32xf32, #tpu.memory_space<vmem>>, %arg9: memref<32x32xf32, #tpu.memory_space<vmem>>, %arg10: memref<32x1xf32, #tpu.memory_space<vmem>>, %arg11: memref<3x32xf32, #tpu.memory_space<vmem>>, %arg12: memref<3x32xf32, #tpu.memory_space<vmem>>, %arg13: memref<3x32xf32, #tpu.memory_space<vmem>>, %arg14: memref<3x1xf32, #tpu.memory_space<vmem>>, %arg15: memref<3x128xf32, #tpu.memory_space<vmem>>) attributes {dimension_semantics = [#tpu.dimension_semantics<parallel>], iteration_bounds = array<i64: 2>, scalar_prefetch = 0 : i64, scratch_operands = 0 : i64, tpu.core_type = #tpu.core_type<tc>, window_params = [{transform_indices = @transform_0, window_bounds = array<i64: 3, 128>}, {pipeline_mode = #tpu.pipeline_mode<synchronous>, transform_indices = @transform_1, window_bounds = array<i64: 32, 3>}, {pipeline_mode = #tpu.pipeline_mode<synchronous>, transform_indices = @transform_2, window_bounds = array<i64: 32, 1>}, {pipeline_mode = #tpu.pipeline_mode<synchronous>, transform_indices = @transform_3, window_bounds = array<i64: 32, 32>}, {pipeline_mode = #tpu.pipeline_mode<synchronous>, transform_indices = @transform_4, window_bounds = array<i64: 32, 1>}, {pipeline_mode = #tpu.pipeline_mode<synchronous>, transform_indices = @transform_5, window_bounds = array<i64: 32, 2>}, {pipeline_mode = #tpu.pipeline_mode<synchronous>, transform_indices = @transform_6, window_bounds = array<i64: 32, 32>}, {pipeline_mode = #tpu.pipeline_mode<synchronous>, transform_indices = @transform_7, window_bounds = array<i64: 32, 32>}, {pipeline_mode = #tpu.pipeline_mode<synchronous>, transform_indices = @transform_8, window_bounds = array<i64: 32, 32>}, {pipeline_mode = #tpu.pipeline_mode<synchronous>, transform_indices = @transform_9, window_bounds = array<i64: 32, 1>}, {pipeline_mode = #tpu.pipeline_mode<synchronous>, transform_indices = @transform_10, window_bounds = array<i64: 3, 32>}, {pipeline_mode = #tpu.pipeline_mode<synchronous>, transform_indices = @transform_11, window_bounds = array<i64: 3, 32>}, {pipeline_mode = #tpu.pipeline_mode<synchronous>, transform_indices = @transform_12, window_bounds = array<i64: 3, 32>}, {pipeline_mode = #tpu.pipeline_mode<synchronous>, transform_indices = @transform_13, window_bounds = array<i64: 3, 1>}, {transform_indices = @transform_14, window_bounds = array<i64: 3, 128>}]} {
    %0 = tpu.iota {dimensions = array<i32: 1>} : vector<1x128xi32>
    %c128_i32 = arith.constant 128 : i32
    %c0_i32 = arith.constant 0 : i32
    %1 = arith.cmpi eq, %c128_i32, %c0_i32 : i32
    %c1_i32 = arith.constant 1 : i32
    %2 = arith.select %1, %c1_i32, %c128_i32 : i32
    %3 = vector.broadcast %2 : i32 to vector<1x128xi32>
    %4 = arith.remsi %0, %3 : vector<1x128xi32>
    %c0_i32_0 = arith.constant 0 : i32
    %5 = vector.broadcast %c0_i32_0 : i32 to vector<1x128xi32>
    %6 = arith.cmpi ne, %4, %5 : vector<1x128xi32>
    %c0_i32_1 = arith.constant 0 : i32
    %7 = vector.broadcast %c0_i32_1 : i32 to vector<1x128xi32>
    %8 = arith.cmpi slt, %4, %7 : vector<1x128xi32>
    %c0_i32_2 = arith.constant 0 : i32
    %9 = arith.cmpi slt, %2, %c0_i32_2 : i32
    %10 = vector.broadcast %9 : i1 to vector<1x128xi1>
    %11 = vector.broadcast %10 : vector<1x128xi1> to vector<1x128xi1>
    %12 = arith.xori %8, %11 : vector<1x128xi1>
    %13 = arith.andi %12, %6 : vector<1x128xi1>
    %14 = vector.broadcast %2 : i32 to vector<1x128xi32>
    %15 = arith.addi %4, %14 : vector<1x128xi32>
    %16 = arith.select %13, %15, %4 : vector<1x128xi1>, vector<1x128xi32>
    %c16_i32 = arith.constant 16 : i32
    %17 = vector.broadcast %c16_i32 : i32 to vector<1x128xi32>
    %18 = arith.cmpi sge, %16, %17 : vector<1x128xi32>
    %c112_i32 = arith.constant 112 : i32
    %19 = vector.broadcast %c112_i32 : i32 to vector<1x128xi32>
    %20 = arith.cmpi slt, %16, %19 : vector<1x128xi32>
    %c0 = arith.constant 0 : index
    %c0_3 = arith.constant 0 : index
    %21 = vector.load %arg1[%c0, %c0_3] : memref<3x128xf32, #tpu.memory_space<vmem>>, vector<3x128xf32>
    %c0_4 = arith.constant 0 : index
    %c0_5 = arith.constant 0 : index
    %22 = vector.load %arg2[%c0_4, %c0_5] : memref<32x3xf32, #tpu.memory_space<vmem>>, vector<32x3xf32>
    %cst = arith.constant dense<0.000000e+00> : vector<32x128xf32>
    %23 = tpu.matmul %22, %21, %cst {dimension_numbers = #tpu.dot_dimension_numbers<[1], [0], [0], [1], [0, 0, 1, 1], [], []>} : vector<32x3xf32>, vector<3x128xf32>, vector<32x128xf32> -> vector<32x128xf32>
    %c0_6 = arith.constant 0 : index
    %c0_7 = arith.constant 0 : index
    %24 = vector.load %arg3[%c0_6, %c0_7] : memref<32x1xf32, #tpu.memory_space<vmem>>, vector<32x1xf32>
    %25 = vector.broadcast %24 : vector<32x1xf32> to vector<32x128xf32>
    %26 = arith.addf %23, %25 : vector<32x128xf32>
    %cst_8 = arith.constant 0.000000e+00 : f32
    %27 = vector.broadcast %cst_8 : f32 to vector<32x128xf32>
    %28 = arith.maximumf %26, %27 : vector<32x128xf32>
    %c0_9 = arith.constant 0 : index
    %c0_10 = arith.constant 0 : index
    %29 = vector.load %arg4[%c0_9, %c0_10] : memref<32x32xf32, #tpu.memory_space<vmem>>, vector<32x32xf32>
    %cst_11 = arith.constant dense<0.000000e+00> : vector<32x128xf32>
    %30 = tpu.matmul %29, %28, %cst_11 {dimension_numbers = #tpu.dot_dimension_numbers<[1], [0], [0], [1], [0, 0, 1, 1], [], []>} : vector<32x32xf32>, vector<32x128xf32>, vector<32x128xf32> -> vector<32x128xf32>
    %c0_12 = arith.constant 0 : index
    %c0_13 = arith.constant 0 : index
    %31 = vector.load %arg5[%c0_12, %c0_13] : memref<32x1xf32, #tpu.memory_space<vmem>>, vector<32x1xf32>
    %32 = vector.broadcast %31 : vector<32x1xf32> to vector<32x128xf32>
    %33 = arith.addf %30, %32 : vector<32x128xf32>
    %cst_14 = arith.constant 0.000000e+00 : f32
    %34 = vector.broadcast %cst_14 : f32 to vector<32x128xf32>
    %35 = arith.maximumf %33, %34 : vector<32x128xf32>
    %c0_15 = arith.constant 0 : index
    %c0_16 = arith.constant 0 : index
    %36 = vector.load %arg6[%c0_15, %c0_16] : memref<32x2xf32, #tpu.memory_space<vmem>>, vector<32x1xf32>
    %37 = vector.broadcast %36 : vector<32x1xf32> to vector<32x128xf32>
    %38 = arith.mulf %35, %37 : vector<32x128xf32>
    %c0_17 = arith.constant 0 : index
    %c1 = arith.constant 1 : index
    %39 = vector.load %arg6[%c0_17, %c1] : memref<32x2xf32, #tpu.memory_space<vmem>>, vector<32x1xf32>
    %40 = vector.broadcast %39 : vector<32x1xf32> to vector<32x128xf32>
    %41 = arith.addf %38, %40 : vector<32x128xf32>
    %c0_18 = arith.constant 0 : index
    %c0_19 = arith.constant 0 : index
    %42 = vector.load %arg8[%c0_18, %c0_19] : memref<32x32xf32, #tpu.memory_space<vmem>>, vector<32x32xf32>
    %cst_20 = arith.constant dense<0.000000e+00> : vector<32x128xf32>
    %43 = tpu.matmul %42, %41, %cst_20 {dimension_numbers = #tpu.dot_dimension_numbers<[1], [0], [0], [1], [0, 0, 1, 1], [], []>} : vector<32x32xf32>, vector<32x128xf32>, vector<32x128xf32> -> vector<32x128xf32>
    %c0_21 = arith.constant 0 : index
    %c0_22 = arith.constant 0 : index
    %44 = vector.load %arg7[%c0_21, %c0_22] : memref<32x32xf32, #tpu.memory_space<vmem>>, vector<32x32xf32>
    %c16_i32_23 = arith.constant 16 : i32
    %45 = tpu.dynamic_rotate %41 by %c16_i32_23 dim 1 : vector<32x128xf32>, i32 -> vector<32x128xf32>
    %cst_24 = arith.constant 0.000000e+00 : f32
    %46 = vector.shape_cast %18 : vector<1x128xi1> to vector<1x128xi1>
    %47 = vector.broadcast %46 : vector<1x128xi1> to vector<32x128xi1>
    %48 = vector.broadcast %cst_24 : f32 to vector<32x128xf32>
    %49 = arith.select %47, %45, %48 : vector<32x128xi1>, vector<32x128xf32>
    %cst_25 = arith.constant dense<0.000000e+00> : vector<32x128xf32>
    %50 = tpu.matmul %44, %49, %cst_25 {dimension_numbers = #tpu.dot_dimension_numbers<[1], [0], [0], [1], [0, 0, 1, 1], [], []>} : vector<32x32xf32>, vector<32x128xf32>, vector<32x128xf32> -> vector<32x128xf32>
    %51 = arith.addf %43, %50 : vector<32x128xf32>
    %c0_26 = arith.constant 0 : index
    %c0_27 = arith.constant 0 : index
    %52 = vector.load %arg9[%c0_26, %c0_27] : memref<32x32xf32, #tpu.memory_space<vmem>>, vector<32x32xf32>
    %c112_i32_28 = arith.constant 112 : i32
    %53 = tpu.dynamic_rotate %41 by %c112_i32_28 dim 1 : vector<32x128xf32>, i32 -> vector<32x128xf32>
    %cst_29 = arith.constant 0.000000e+00 : f32
    %54 = vector.shape_cast %20 : vector<1x128xi1> to vector<1x128xi1>
    %55 = vector.broadcast %54 : vector<1x128xi1> to vector<32x128xi1>
    %56 = vector.broadcast %cst_29 : f32 to vector<32x128xf32>
    %57 = arith.select %55, %53, %56 : vector<32x128xi1>, vector<32x128xf32>
    %cst_30 = arith.constant dense<0.000000e+00> : vector<32x128xf32>
    %58 = tpu.matmul %52, %57, %cst_30 {dimension_numbers = #tpu.dot_dimension_numbers<[1], [0], [0], [1], [0, 0, 1, 1], [], []>} : vector<32x32xf32>, vector<32x128xf32>, vector<32x128xf32> -> vector<32x128xf32>
    %59 = arith.addf %51, %58 : vector<32x128xf32>
    %c0_31 = arith.constant 0 : index
    %c0_32 = arith.constant 0 : index
    %60 = vector.load %arg10[%c0_31, %c0_32] : memref<32x1xf32, #tpu.memory_space<vmem>>, vector<32x1xf32>
    %61 = vector.broadcast %60 : vector<32x1xf32> to vector<32x128xf32>
    %62 = arith.addf %59, %61 : vector<32x128xf32>
    %c0_33 = arith.constant 0 : index
    %c0_34 = arith.constant 0 : index
    %63 = vector.load %arg12[%c0_33, %c0_34] : memref<3x32xf32, #tpu.memory_space<vmem>>, vector<3x32xf32>
    %cst_35 = arith.constant dense<0.000000e+00> : vector<3x128xf32>
    %64 = tpu.matmul %63, %62, %cst_35 {dimension_numbers = #tpu.dot_dimension_numbers<[1], [0], [0], [1], [0, 0, 1, 1], [], []>} : vector<3x32xf32>, vector<32x128xf32>, vector<3x128xf32> -> vector<3x128xf32>
    %c0_36 = arith.constant 0 : index
    %c0_37 = arith.constant 0 : index
    %65 = vector.load %arg11[%c0_36, %c0_37] : memref<3x32xf32, #tpu.memory_space<vmem>>, vector<3x32xf32>
    %c16_i32_38 = arith.constant 16 : i32
    %66 = tpu.dynamic_rotate %62 by %c16_i32_38 dim 1 : vector<32x128xf32>, i32 -> vector<32x128xf32>
    %cst_39 = arith.constant 0.000000e+00 : f32
    %67 = vector.shape_cast %18 : vector<1x128xi1> to vector<1x128xi1>
    %68 = vector.broadcast %67 : vector<1x128xi1> to vector<32x128xi1>
    %69 = vector.broadcast %cst_39 : f32 to vector<32x128xf32>
    %70 = arith.select %68, %66, %69 : vector<32x128xi1>, vector<32x128xf32>
    %cst_40 = arith.constant dense<0.000000e+00> : vector<3x128xf32>
    %71 = tpu.matmul %65, %70, %cst_40 {dimension_numbers = #tpu.dot_dimension_numbers<[1], [0], [0], [1], [0, 0, 1, 1], [], []>} : vector<3x32xf32>, vector<32x128xf32>, vector<3x128xf32> -> vector<3x128xf32>
    %72 = arith.addf %64, %71 : vector<3x128xf32>
    %c0_41 = arith.constant 0 : index
    %c0_42 = arith.constant 0 : index
    %73 = vector.load %arg13[%c0_41, %c0_42] : memref<3x32xf32, #tpu.memory_space<vmem>>, vector<3x32xf32>
    %c112_i32_43 = arith.constant 112 : i32
    %74 = tpu.dynamic_rotate %62 by %c112_i32_43 dim 1 : vector<32x128xf32>, i32 -> vector<32x128xf32>
    %cst_44 = arith.constant 0.000000e+00 : f32
    %75 = vector.shape_cast %20 : vector<1x128xi1> to vector<1x128xi1>
    %76 = vector.broadcast %75 : vector<1x128xi1> to vector<32x128xi1>
    %77 = vector.broadcast %cst_44 : f32 to vector<32x128xf32>
    %78 = arith.select %76, %74, %77 : vector<32x128xi1>, vector<32x128xf32>
    %cst_45 = arith.constant dense<0.000000e+00> : vector<3x128xf32>
    %79 = tpu.matmul %73, %78, %cst_45 {dimension_numbers = #tpu.dot_dimension_numbers<[1], [0], [0], [1], [0, 0, 1, 1], [], []>} : vector<3x32xf32>, vector<32x128xf32>, vector<3x128xf32> -> vector<3x128xf32>
    %80 = arith.addf %72, %79 : vector<3x128xf32>
    %c0_46 = arith.constant 0 : index
    %c0_47 = arith.constant 0 : index
    %81 = vector.load %arg14[%c0_46, %c0_47] : memref<3x1xf32, #tpu.memory_space<vmem>>, vector<3x1xf32>
    %82 = vector.broadcast %81 : vector<3x1xf32> to vector<3x128xf32>
    %83 = arith.addf %80, %82 : vector<3x128xf32>
    %c0_48 = arith.constant 0 : index
    %c0_49 = arith.constant 0 : index
    %84 = vector.load %arg15[%c0_48, %c0_49] : memref<3x128xf32, #tpu.memory_space<vmem>>, vector<3x128xf32>
    tpu.vector_store %arg15[%c0_48, %c0_49], %83 {strides = array<i32>} : memref<3x128xf32, #tpu.memory_space<vmem>>, vector<3x128xf32>,
    return
  }
  func.func @transform_0(%arg0: i32) -> (i32, i32) {
    %c0_i32 = arith.constant 0 : i32
    %c0_i32_0 = arith.constant 0 : i32
    return %c0_i32, %arg0 : i32, i32
  }
  func.func @transform_1(%arg0: i32) -> (i32, i32) {
    %c0_i32 = arith.constant 0 : i32
    %c0_i32_0 = arith.constant 0 : i32
    %c0_i32_1 = arith.constant 0 : i32
    return %c0_i32, %c0_i32_0 : i32, i32
  }
  func.func @transform_2(%arg0: i32) -> (i32, i32) {
    %c0_i32 = arith.constant 0 : i32
    %c0_i32_0 = arith.constant 0 : i32
    %c0_i32_1 = arith.constant 0 : i32
    return %c0_i32, %c0_i32_0 : i32, i32
  }
  func.func @transform_3(%arg0: i32) -> (i32, i32) {
    %c0_i32 = arith.constant 0 : i32
    %c0_i32_0 = arith.constant 0 : i32
    %c0_i32_1 = arith.constant 0 : i32
    return %c0_i32, %c0_i32_0 : i32, i32
  }
  func.func @transform_4(%arg0: i32) -> (i32, i32) {
    %c0_i32 = arith.constant 0 : i32
    %c0_i32_0 = arith.constant 0 : i32
    %c0_i32_1 = arith.constant 0 : i32
    return %c0_i32, %c0_i32_0 : i32, i32
  }
  func.func @transform_5(%arg0: i32) -> (i32, i32) {
    %c0_i32 = arith.constant 0 : i32
    %c0_i32_0 = arith.constant 0 : i32
    %c0_i32_1 = arith.constant 0 : i32
    return %c0_i32, %c0_i32_0 : i32, i32
  }
  func.func @transform_6(%arg0: i32) -> (i32, i32) {
    %c0_i32 = arith.constant 0 : i32
    %c0_i32_0 = arith.constant 0 : i32
    %c0_i32_1 = arith.constant 0 : i32
    return %c0_i32, %c0_i32_0 : i32, i32
  }
  func.func @transform_7(%arg0: i32) -> (i32, i32) {
    %c0_i32 = arith.constant 0 : i32
    %c0_i32_0 = arith.constant 0 : i32
    %c0_i32_1 = arith.constant 0 : i32
    return %c0_i32, %c0_i32_0 : i32, i32
  }
  func.func @transform_8(%arg0: i32) -> (i32, i32) {
    %c0_i32 = arith.constant 0 : i32
    %c0_i32_0 = arith.constant 0 : i32
    %c0_i32_1 = arith.constant 0 : i32
    return %c0_i32, %c0_i32_0 : i32, i32
  }
  func.func @transform_9(%arg0: i32) -> (i32, i32) {
    %c0_i32 = arith.constant 0 : i32
    %c0_i32_0 = arith.constant 0 : i32
    %c0_i32_1 = arith.constant 0 : i32
    return %c0_i32, %c0_i32_0 : i32, i32
  }
  func.func @transform_10(%arg0: i32) -> (i32, i32) {
    %c0_i32 = arith.constant 0 : i32
    %c0_i32_0 = arith.constant 0 : i32
    %c0_i32_1 = arith.constant 0 : i32
    return %c0_i32, %c0_i32_0 : i32, i32
  }
  func.func @transform_11(%arg0: i32) -> (i32, i32) {
    %c0_i32 = arith.constant 0 : i32
    %c0_i32_0 = arith.constant 0 : i32
    %c0_i32_1 = arith.constant 0 : i32
    return %c0_i32, %c0_i32_0 : i32, i32
  }
  func.func @transform_12(%arg0: i32) -> (i32, i32) {
    %c0_i32 = arith.constant 0 : i32
    %c0_i32_0 = arith.constant 0 : i32
    %c0_i32_1 = arith.constant 0 : i32
    return %c0_i32, %c0_i32_0 : i32, i32
  }
  func.func @transform_13(%arg0: i32) -> (i32, i32) {
    %c0_i32 = arith.constant 0 : i32
    %c0_i32_0 = arith.constant 0 : i32
    %c0_i32_1 = arith.constant 0 : i32
    return %c0_i32, %c0_i32_0 : i32, i32
  }
  func.func @transform_14(%arg0: i32) -> (i32, i32) {
    %c0_i32 = arith.constant 0 : i32
    %c0_i32_0 = arith.constant 0 : i32
    return %c0_i32, %arg0 : i32, i32
  }
}

</mosaic_0001>

<bundles_post_ra>
// kernel: stgcn_forward.1
= control target key start
LH: loop header
LB: loop body
LE: loop exit
PB: predicated region body
PF: predicated region fallthrough
CT: control target
= control target key end

     0   :  { %s1770_s29 = smov 0   ;;  %s2023_s0 = inlined_call_operand.vmem [shape: f32[3,256], index: 0, kind: input, shape index: {}]   ;;  %s2024_s1 = inlined_call_operand.vmem [shape: f32[32,3], index: 1, kind: input, shape index: {}]   ;;  %s2025_s2 = inlined_call_operand.vmem [shape: f32[32,1], index: 2, kind: input, shape index: {}]   ;;  %s2026_s3 = inlined_call_operand.vmem [shape: f32[32,32], index: 3, kind: input, shape index: {}]   ;;  %s2027_s4 = inlined_call_operand.vmem [shape: f32[32,1], index: 4, kind: input, shape index: {}]   ;;  %s2028_s5 = inlined_call_operand.vmem [shape: f32[32,2], index: 5, kind: input, shape index: {}]   ;;  %s2029_s6 = inlined_call_operand.vmem [shape: f32[32,32], index: 6, kind: input, shape index: {}]   ;;  %s2030_s7 = inlined_call_operand.vmem [shape: f32[32,32], index: 7, kind: input, shape index: {}]   ;;  %s2031_s8 = inlined_call_operand.vmem [shape: f32[32,32], index: 8, kind: input, shape index: {}]   ;;  %s2032_s9 = inlined_call_operand.vmem [shape: f32[32,1], index: 9, kind: input, shape index: {}]   ;;  %s2033_s10 = inlined_call_operand.vmem [shape: f32[3,32], index: 10, kind: input, shape index: {}]   ;;  %s2034_s11 = inlined_call_operand.vmem [shape: f32[3,32], index: 11, kind: input, shape index: {}]   ;;  %s2035_s12 = inlined_call_operand.vmem [shape: f32[3,32], index: 12, kind: input, shape index: {}]   ;;  %s2036_s13 = inlined_call_operand.vmem [shape: f32[3,1], index: 13, kind: input, shape index: {}]   ;;  %s2037_s14 = inlined_call_operand.vmem [shape: f32[3,256], index: 14, kind: output, shape index: {}]  }
   0x1 LB: > { %s1463_s30 = sadd.s32 4294967295, %s1687_s29   ;;  %p1467_p0 = scmp.ge.s32.totalorder %s1687_s29, 1  ;;  %s1687_s29 = sphi %s1770_s29, %s24_s29  }
   0x2   : > { %p411_p1 = scmp.lt.s32.totalorder %s1687_s29, 3 }
   0x4   : > { %p412_p2 = pnand %p1467_p0, %p411_p1 }
   0x5   : > { %p455_p3 = scmp.lt.s32.totalorder (!%p412_p2), %s1463_s30, 1  ;;  %s1691_s24 = smov (!%p412_p2), 16  }
   0x6   : > { %415 = sbr.rel (%p412_p2) target bundleno = 1091 (0x443), region = 76  ;;  %s1692_s15 = smov (!%p412_p2), 112  }
   0xb   : > { %v480_v0 = vld [vmem:[%s2024_s1] sm:$0xff]  ;;  %vm508_vm0 = vcmask 23552   ;;  %v485_v1 = vld [vmem:[%s2025_s2 + $0x8] sm:$0xff]  ;;  %s2039_s30 = smov (!%p455_p3, %s1463_s30), 1  ;;  %v1689_v2 = vmov 0   ;;  %v487_v3 = vld [vmem:[%s2025_s2 + $0x18] sm:$0xff] }
   0xc   : > { %1566 = vmatprep.mubr.msk.f32.mxu0 %vm508_vm0, %v480_v0  ;;  %1676 = vset.pattern.permute.xlu1 %v1689_v2  ;;  %s1468_s21 = sshll.u32 %s2039_s30, 2  ;;  %vm521_vm1 = vcmask 1042432   ;;  %v484_v4 = vld [vmem:[%s2025_s2] sm:$0xff]  ;;  %v486_v5 = vld [vmem:[%s2025_s2 + $0x10] sm:$0xff]  ;;  %v481_v7 = vld [vmem:[%s2024_s1 + $0x8] sm:$0xff]  ;;  %vm642_vm2 = vcmask 261120  }
   0xd   : > { %1675 = vset.pattern.permute.xlu0 %v1689_v2  ;;  %495 = vperm.xlu1 %1676, %v485_v1   ;;  %s458_s26 = scalar_lea.vmem %s2023_s0, %s1468_s21  ;;  %v482_v8 = vld [vmem:[%s2024_s1 + $0x10] sm:$0xff]  ;;  %v483_v10 = vld [vmem:[%s2024_s1 + $0x18] sm:$0xff]  ;;  %v745_v13 = vld [vmem:[%s2028_s5 + $0x8] sm:$0xff]  ;;  %v1690_v15 = vmov 1   ;;  %vm1694_vm5 = vmmov 0   ;;  %s462_s28 = scalar_lea.vmem %s2037_s14, %s1468_s21 }
   0xe   : > { %505 = vperm.xlu0 %1675, %v487_v3   ;;  %v479_v6 = vld [vmem:[%s458_s26] sm:$0x7]  ;;  %v620_v9 = vld [vmem:[%s2027_s4 + $0x10] sm:$0xff]  ;;  %v747_v11 = vld [vmem:[%s2028_s5 + $0x18] sm:$0xff] }
   0xf   : > { %1564 = vmatprep.subr.msk.mxu0 %vm521_vm1, %v479_v6  ;;  %v746_v12 = vld [vmem:[%s2028_s5 + $0x10] sm:$0xff]  ;;  %v614_v14 = vld [vmem:[%s2026_s3] sm:$0xff]  ;;  %v621_v16 = vld [vmem:[%s2027_s4 + $0x18] sm:$0xff] }
  0x10   : > { %1565 = vmatpush3.msk.msra.mxu0 %vm521_vm1, %v479_v6  ;;  %1580 = vmatprep.mubr.msk.f32.mxu1 %vm642_vm2, %v614_v14  ;;  %v619_v17 = vld [vmem:[%s2027_s4 + $0x8] sm:$0xff]  ;;  %v744_v18 = vld [vmem:[%s2028_s5] sm:$0xff]  ;;  %v616_v37 = vld [vmem:[%s2026_s3 + $0x10] sm:$0xff] }
  0x11   : > { %490 = vperm.xlu1 %1676, %v484_v4   ;;  %1567 = vmatmul.mubr.msk.f32.vlgmr.msra.gmra.mxu0 %vm508_vm0, %v481_v7  ;;  %v618_v19 = vld [vmem:[%s2027_s4] sm:$0xff]  ;;  %v615_v36 = vld [vmem:[%s2026_s3 + $0x8] sm:$0xff]  ;;  %v617_v38 = vld [vmem:[%s2026_s3 + $0x18] sm:$0xff] }
  0x12   : > { %500 = vperm.xlu0 %1675, %v486_v5   ;;  %1569 = vmatprep.mubr.msk.f32.mxu0 %vm508_vm0, %v482_v8  ;;  %v796_v55 = vld [vmem:[%s2029_s6] sm:$0xff]  ;;  %v1128_v14 = vld [vmem:[%s2032_s9 + $0x8] sm:$0xff] }
  0x13   : > { %v792_v56 = vld [vmem:[%s2030_s7] sm:$0xff] }
  0x15   : > { %634 = vperm.xlu1 %1676, %v620_v9   ;;  %1570 = vmatmul.mubr.msk.f32.gmra.mxu0 %vm508_vm0, %v483_v10  ;;  %v793_v9 = vld [vmem:[%s2030_s7 + $0x8] sm:$0xff]  ;;  %v794_v10 = vld [vmem:[%s2030_s7 + $0x10] sm:$0xff] }
  0x16   : > { %1677 = vset.pattern.permute.xlu0 %v1690_v15  ;;  %1594 = vmatprep.mubr.msk.f32.mxu0 %vm642_vm2, %v796_v55 }
  0x17   : > { %785 = vperm.xlu0 %1677, %v747_v11  }
  0x19   : > { %765 = vperm.xlu1 %1676, %v747_v11   ;;  %v795_v11 = vld [vmem:[%s2030_s7 + $0x18] sm:$0xff] }
  0x1b   : > { %1678 = vset.pattern.permute.xlu0 %v1689_v2 }
  0x1c   : > { %639 = vperm.xlu0 %1678, %v621_v16   ;;  %v463_v16 = vlaneseq }
  0x1d   : > { %760 = vperm.xlu1 %1676, %v746_v12  }
  0x20   : > { %629 = vperm.xlu0 %1678, %v619_v17   ;;  %v1894_v17 = vand.u32 127, %v463_v16 }
  0x21   : > { %755 = vperm.xlu1 %1676, %v745_v13  }
  0x22   : > { %vm477_vm3 = vcmp.ge.s32.totalorder %v1894_v17, 16  ;;  %vm478_vm4 = vcmp.lt.s32.totalorder %v1894_v17, 112 }
  0x24   : > { %624 = vperm.xlu0 %1678, %v618_v19  }
  0x25   : > { %1679 = vset.pattern.permute.xlu1 %v1690_v15  ;;  %v1127_v15 = vld [vmem:[%s2032_s9] sm:$0xff] }
  0x26   : > { %781 = vperm.xlu1 %1679, %v746_v12   ;;  %v1130_v12 = vld [vmem:[%s2032_s9 + $0x18] sm:$0xff] }
  0x28   : > { %750 = vperm.xlu0 %1678, %v744_v18  }
  0x2a   : > { %777 = vperm.xlu1 %1679, %v745_v13   ;;  %v1129_v13 = vld [vmem:[%s2032_s9 + $0x10] sm:$0xff] }
  0x2e   : > { %773 = vperm.xlu1 %1679, %v744_v18  }
  0x32   : > { %1680 = vset.pattern.permute.xlu1 %v1689_v2 }
  0x88   : > { %v496_v22 = vpop.permute.xlu1 %495 }
  0x89   : > { %v506_v20 = vpop.permute.xlu0 %505 }
  0x8c   : > { %v491_v31 = vpop.permute.xlu1 %490 }
  0x8d   : > { %v501_v26 = vpop.permute.xlu0 %500 }
  0x90   : > { %v635_v39 = vpop.permute.xlu1 %634 }
  0x92   : > { %v786_v41 = vpop.permute.xlu0 %785 }
  0x94   : > { %v766_v40 = vpop.permute.xlu1 %765 }
  0x97   : > { %v640_v43 = vpop.permute.xlu0 %639 }
  0x98   : > { %v761_v42 = vpop.permute.xlu1 %760 }
  0x9b   : > { %v630_v45 = vpop.permute.xlu0 %629 }
  0x9c   : > { %v756_v44 = vpop.permute.xlu1 %755 }
  0x9f   : > { %v625_v50 = vpop.permute.xlu0 %624 }
  0xa1   : > { %v782_v47 = vpop.permute.xlu1 %781 }
  0xa3   : > { %v751_v3 = vpop.permute.xlu0 %750 }
  0xa5   : > { %v778_v60 = vpop.permute.xlu1 %777 }
  0xa9   : > { %v774_v6 = vpop.permute.xlu1 %773 }
  0xd1   : > { %v1568_v21 = vpop.f32.mrf.mxu0 }
  0xd2   : > { %v597_v28 = vadd.f32 %v1568_v21, %v496_v22  ;;  %v797_v22 = vld [vmem:[%s2029_s6 + $0x8] sm:$0xff] }
  0xd3   : > { %v591_v23 = vpop.f32.mrf.mxu0 }
  0xd4   : > { %v592_v32 = vadd.f32 %v591_v23, %v491_v31  ;;  %v611_v34 = vmax.f32 %v597_v28, 0.0  ;;  %v798_v23 = vld [vmem:[%s2029_s6 + $0x10] sm:$0xff] }
  0xd5   : > { %v1571_v24 = vpop.f32.mrf.mxu0  ;;  %v1010_v31 = vld [vmem:[%s2031_s8 + $0x10] sm:$0xff] }
  0xd6   : > { %v607_v25 = vadd.f32 %v1571_v24, %v506_v20  ;;  %v610_v35 = vmax.f32 %v592_v32, 0.0  ;;  %v1011_v32 = vld [vmem:[%s2031_s8 + $0x18] sm:$0xff] }
  0xd7   : > { %v601_v27 = vpop.f32.mrf.mxu0 }
  0xd8   : > { %v613_v29 = vmax.f32 %v607_v25, 0.0  ;;  %v602_v30 = vadd.f32 %v601_v27, %v501_v26  ;;  %v799_v26 = vld [vmem:[%s2029_s6 + $0x18] sm:$0xff]  ;;  %v1008_v27 = vld [vmem:[%s2031_s8] sm:$0xff] }
  0xda   : > { %v612_v33 = vmax.f32 %v602_v30, 0.0  ;;  %1572 = vmatprep.subr.mxu1 %v613_v29  ;;  %v1009_v30 = vld [vmem:[%s2031_s8 + $0x8] sm:$0xff] }
  0xdb   : > { %1573 = vmatpush3.msra.mxu1 %v613_v29 }
  0xdc   : > { %1574 = vmatprep.subr.mxu1 %v612_v33 }
  0xdd   : > { %1575 = vmatpush3.msra.mxu1 %v612_v33  ;;  %v1693_v33 = vmov 0.0  }
  0xde   : > { %1576 = vmatprep.subr.mxu1 %v611_v34 }
  0xdf   : > { %1577 = vmatpush3.msra.mxu1 %v611_v34 }
  0xe0   : > { %1578 = vmatprep.subr.mxu1 %v610_v35 }
  0xe1   : > { %1579 = vmatpush3.msra.mxu1 %v610_v35 }
  0xe2   : > { %1581 = vmatmul.mubr.msk.f32.vlgmr.msra.gmra.mxu1 %vm642_vm2, %v615_v36 }
  0xe3   : > { %1583 = vmatprep.mubr.msk.f32.mxu1 %vm642_vm2, %v616_v37 }
  0xe6   : > { %1584 = vmatmul.mubr.msk.f32.gmra.mxu1 %vm642_vm2, %v617_v38 }
  0xe7   : > { %1608 = vmatprep.mubr.msk.f32.mxu1 %vm642_vm2, %v792_v56 }
 0x1a2   : > { %v1582_v46 = vpop.f32.mrf.mxu1 }
 0x1a3   : > { %v727_v49 = vadd.f32 %v1582_v46, %v630_v45 }
 0x1a4   : > { %v721_v48 = vpop.f32.mrf.mxu1 }
 0x1a5   : > { %v722_v52 = vadd.f32 %v721_v48, %v625_v50  ;;  %v741_v57 = vmax.f32 %v727_v49, 0.0 }
 0x1a6   : > { %v1585_v51 = vpop.f32.mrf.mxu1 }
 0x1a7   : > { %v737_v53 = vadd.f32 %v1585_v51, %v640_v43  ;;  %v740_v61 = vmax.f32 %v722_v52, 0.0  ;;  %v769_v0 = vmul.f32 %v756_v44, %v741_v57 }
 0x1a8   : > { %v731_v54 = vpop.f32.mrf.mxu1 }
 0x1a9   : > { %v743_v58 = vmax.f32 %v737_v53, 0.0  ;;  %v732_v59 = vadd.f32 %v731_v54, %v635_v39  ;;  %v768_v5 = vmul.f32 %v751_v3, %v740_v61  ;;  %v789_v7 = vadd.f32 %v778_v60, %v769_v0  ;;  %v1156_v3 = vld [vmem:[%s2033_s10] sm:$0x7] }
 0x1ab   : > { %v771_v62 = vmul.f32 %v766_v40, %v743_v58  ;;  %v742_v63 = vmax.f32 %v732_v59, 0.0  ;;  %v788_v8 = vadd.f32 %v774_v6, %v768_v5 }
 0x1ad   : > { %v791_v1 = vadd.f32 %v786_v41, %v771_v62  ;;  %v770_v2 = vmul.f32 %v761_v42, %v742_v63  ;;  %v1155_v62 = vld [vmem:[%s2034_s11] sm:$0x7] }
 0x1ae   : > { %v1402_v63 = vld [vmem:[%s2036_s13] sm:$0x7] }
 0x1af   : > { %v790_v4 = vadd.f32 %v782_v47, %v770_v2  ;;  %806 = vrot.lane.b32.xlu0 %v791_v1, %s1691_s24  ;;  %1600 = vmatprep.subr.mxu1 %v791_v1 }
 0x1b0   : > { %1601 = vmatpush3.msra.mxu1 %v791_v1 }
 0x1b1   : > { %804 = vrot.lane.b32.xlu1 %v790_v4, %s1691_s24  ;;  %1602 = vmatprep.subr.mxu1 %v790_v4 }
 0x1b2   : > { %1603 = vmatpush3.msra.mxu1 %v790_v4 }
 0x1b3   : > { %802 = vrot.lane.b32.xlu0 %v789_v7, %s1691_s24  ;;  %1604 = vmatprep.subr.mxu1 %v789_v7 }
 0x1b4   : > { %1605 = vmatpush3.msra.mxu1 %v789_v7 }
 0x1b5   : > { %800 = vrot.lane.b32.xlu1 %v788_v8, %s1691_s24  ;;  %1606 = vmatprep.subr.mxu1 %v788_v8 }
 0x1b6   : > { %1607 = vmatpush3.msra.mxu1 %v788_v8 }
 0x1b7   : > { %1018 = vrot.lane.b32.xlu0 %v791_v1, %s1692_s15  ;;  %1609 = vmatmul.mubr.msk.f32.vlgmr.msra.gmra.mxu1 %vm642_vm2, %v793_v9 }
 0x1b8   : > { %1611 = vmatprep.mubr.msk.f32.mxu1 %vm642_vm2, %v794_v10  ;;  %1628 = vmatprep.subr.mxu1 %v1693_v33 }
 0x1b9   : > { %1016 = vrot.lane.b32.xlu1 %v790_v4, %s1692_s15 }
 0x1bb   : > { %1014 = vrot.lane.b32.xlu0 %v789_v7, %s1692_s15  ;;  %1612 = vmatmul.mubr.msk.f32.gmra.mxu1 %vm642_vm2, %v795_v11 }
 0x1bc   : > { %1636 = vmatprep.mubr.msk.f32.mxu1 %vm1694_vm5, %v1693_v33 }
 0x1bd   : > { %1012 = vrot.lane.b32.xlu1 %v788_v8, %s1692_s15  ;;  %v1315_v8 = vld [vmem:[%s2035_s12] sm:$0x7] }
 0x1bf   : > { %1148 = vperm.xlu0 %1678, %v1130_v12  }
 0x1c1   : > { %1143 = vperm.xlu1 %1680, %v1129_v13  }
 0x1c3   : > { %1138 = vperm.xlu0 %1678, %v1128_v14  }
 0x1c5   : > { %1133 = vperm.xlu1 %1680, %v1127_v15  }
 0x221   : > { %v807_v18 = vpop.permute.xlu0 %806 }
 0x222   : > { %1586 = vmatprep.subr.msk.mxu0 %vm477_vm3, %v807_v18 }
 0x223   : > { %1587 = vmatpush3.msk.msra.mxu0 %vm477_vm3, %v807_v18  ;;  %v805_v19 = vpop.permute.xlu1 %804 }
 0x224   : > { %1588 = vmatprep.subr.msk.mxu0 %vm477_vm3, %v805_v19 }
 0x225   : > { %v803_v20 = vpop.permute.xlu0 %802  ;;  %1589 = vmatpush3.msk.msra.mxu0 %vm477_vm3, %v805_v19 }
 0x226   : > { %1590 = vmatprep.subr.msk.mxu0 %vm477_vm3, %v803_v20 }
 0x227   : > { %1591 = vmatpush3.msk.msra.mxu0 %vm477_vm3, %v803_v20  ;;  %v801_v21 = vpop.permute.xlu1 %800 }
 0x228   : > { %1592 = vmatprep.subr.msk.mxu0 %vm477_vm3, %v801_v21 }
 0x229   : > { %v1019_v24 = vpop.permute.xlu0 %1018  ;;  %1593 = vmatpush3.msk.msra.mxu0 %vm477_vm3, %v801_v21 }
 0x22a   : > { %1595 = vmatmul.mubr.msk.f32.vlgmr.msra.gmra.mxu0 %vm642_vm2, %v797_v22  ;;  %1614 = vmatprep.subr.msk.mxu0 %vm478_vm4, %v1019_v24 }
 0x22b   : > { %1615 = vmatpush3.msk.msra.mxu0 %vm478_vm4, %v1019_v24  ;;  %v1017_v25 = vpop.permute.xlu1 %1016  ;;  %1597 = vmatprep.mubr.msk.f32.mxu0 %vm642_vm2, %v798_v23 }
 0x22c   : > { %1616 = vmatprep.subr.msk.mxu0 %vm478_vm4, %v1017_v25 }
 0x22d   : > { %v1015_v28 = vpop.permute.xlu0 %1014  ;;  %1617 = vmatpush3.msk.msra.mxu0 %vm478_vm4, %v1017_v25 }
 0x22e   : > { %1598 = vmatmul.mubr.msk.f32.gmra.mxu0 %vm642_vm2, %v799_v26  ;;  %1618 = vmatprep.subr.msk.mxu0 %vm478_vm4, %v1015_v28 }
 0x22f   : > { %1619 = vmatpush3.msk.msra.mxu0 %vm478_vm4, %v1015_v28  ;;  %v1013_v29 = vpop.permute.xlu1 %1012  ;;  %1622 = vmatprep.mubr.msk.f32.mxu0 %vm642_vm2, %v1008_v27 }
 0x230   : > { %1620 = vmatprep.subr.msk.mxu0 %vm478_vm4, %v1013_v29 }
 0x231   : > { %1621 = vmatpush3.msk.msra.mxu0 %vm478_vm4, %v1013_v29 }
 0x232   : > { %1623 = vmatmul.mubr.msk.f32.vlgmr.msra.gmra.mxu0 %vm642_vm2, %v1009_v30  ;;  %1639 = vmatprep.subr.mxu0 %v1693_v33 }
 0x233   : > { %1625 = vmatprep.mubr.msk.f32.mxu0 %vm642_vm2, %v1010_v31 }
 0x236   : > { %1626 = vmatmul.mubr.msk.f32.gmra.mxu0 %vm642_vm2, %v1011_v32 }
 0x237   : > { %1647 = vmatprep.mubr.msk.f32.mxu0 %vm1694_vm5, %v1693_v33 }
 0x23a   : > { %v1149_v44 = vpop.permute.xlu0 %1148 }
 0x23c   : > { %v1144_v46 = vpop.permute.xlu1 %1143 }
 0x23e   : > { %v1139_v58 = vpop.permute.xlu0 %1138 }
 0x240   : > { %v1134_v59 = vpop.permute.xlu1 %1133 }
 0x277   : > { %v1610_v34 = vpop.f32.mrf.mxu1 }
 0x279   : > { %v989_v37 = vpop.f32.mrf.mxu1 }
 0x27b   : > { %v1613_v39 = vpop.f32.mrf.mxu1 }
 0x27d   : > { %v999_v42 = vpop.f32.mrf.mxu1 }
 0x2ea   : > { %v1596_v35 = vpop.f32.mrf.mxu0 }
 0x2eb   : > { %v995_v48 = vadd.f32 %v1610_v34, %v1596_v35 }
 0x2ec   : > { %v892_v36 = vpop.f32.mrf.mxu0 }
 0x2ed   : > { %v990_v52 = vadd.f32 %v989_v37, %v892_v36 }
 0x2ee   : > { %v1599_v38 = vpop.f32.mrf.mxu0 }
 0x2ef   : > { %v1005_v45 = vadd.f32 %v1613_v39, %v1599_v38 }
 0x2f0   : > { %v902_v40 = vpop.f32.mrf.mxu0 }
 0x2f1   : > { %v1000_v49 = vadd.f32 %v999_v42, %v902_v40 }
 0x2f2   : > { %v1624_v41 = vpop.f32.mrf.mxu0 }
 0x2f3   : > { %v1124_v53 = vadd.f32 %v1624_v41, %v995_v48 }
 0x2f4   : > { %v1104_v43 = vpop.f32.mrf.mxu0 }
 0x2f5   : > { %v1123_v56 = vadd.f32 %v1104_v43, %v990_v52  ;;  %v1152_v60 = vadd.f32 %v1139_v58, %v1124_v53 }
 0x2f6   : > { %v1627_v47 = vpop.f32.mrf.mxu0 }
 0x2f7   : > { %v1126_v50 = vadd.f32 %v1627_v47, %v1005_v45  ;;  %v1151_v61 = vadd.f32 %v1134_v59, %v1123_v56 }
 0x2f8   : > { %v1114_v51 = vpop.f32.mrf.mxu0 }
 0x2f9   : > { %v1154_v54 = vadd.f32 %v1149_v44, %v1126_v50  ;;  %v1125_v55 = vadd.f32 %v1114_v51, %v1000_v49 }
 0x2fb   : > { %v1153_v57 = vadd.f32 %v1144_v46, %v1125_v55  ;;  %1163 = vrot.lane.b32.xlu0 %v1154_v54, %s1691_s24  ;;  %1640 = vmatpush3.msra.mxu0 %v1154_v54 }
 0x2fc   : > { %1641 = vmatprep.subr.mxu0 %v1693_v33 }
 0x2fd   : > { %1161 = vrot.lane.b32.xlu1 %v1153_v57, %s1691_s24  ;;  %1642 = vmatpush3.msra.mxu0 %v1153_v57 }
 0x2fe   : > { %1643 = vmatprep.subr.mxu0 %v1693_v33 }
 0x2ff   : > { %1159 = vrot.lane.b32.xlu0 %v1152_v60, %s1691_s24  ;;  %1644 = vmatpush3.msra.mxu0 %v1152_v60 }
 0x300   : > { %1645 = vmatprep.subr.mxu0 %v1693_v33 }
 0x301   : > { %1157 = vrot.lane.b32.xlu1 %v1151_v61, %s1691_s24  ;;  %1646 = vmatpush3.msra.mxu0 %v1151_v61 }
 0x302   : > { %1648 = vmatmul.mubr.msk.f32.vlgmr.msra.gmra.mxu0 %vm642_vm2, %v1155_v62 }
 0x303   : > { %1322 = vrot.lane.b32.xlu0 %v1154_v54, %s1692_s15 }
 0x305   : > { %1320 = vrot.lane.b32.xlu1 %v1153_v57, %s1692_s15 }
 0x307   : > { %1318 = vrot.lane.b32.xlu0 %v1152_v60, %s1692_s15 }
 0x309   : > { %1316 = vrot.lane.b32.xlu1 %v1151_v61, %s1692_s15 }
 0x30b   : > { %1405 = vperm.xlu0 %1678, %v1402_v63  }
 0x36d   : > { %v1164_v0 = vpop.permute.xlu0 %1163 }
 0x36e   : > { %1629 = vmatpush3.msk.msra.mxu1 %vm477_vm3, %v1164_v0 }
 0x36f   : > { %1630 = vmatprep.subr.mxu1 %v1693_v33  ;;  %v1162_v1 = vpop.permute.xlu1 %1161 }
 0x370   : > { %1631 = vmatpush3.msk.msra.mxu1 %vm477_vm3, %v1162_v1 }
 0x371   : > { %v1160_v2 = vpop.permute.xlu0 %1159  ;;  %1632 = vmatprep.subr.mxu1 %v1693_v33 }
 0x372   : > { %1633 = vmatpush3.msk.msra.mxu1 %vm477_vm3, %v1160_v2 }
 0x373   : > { %1634 = vmatprep.subr.mxu1 %v1693_v33  ;;  %v1158_v4 = vpop.permute.xlu1 %1157 }
 0x374   : > { %1635 = vmatpush3.msk.msra.mxu1 %vm477_vm3, %v1158_v4 }
 0x375   : > { %v1323_v5 = vpop.permute.xlu0 %1322  ;;  %1637 = vmatmul.mubr.msk.f32.vlgmr.msra.gmra.mxu1 %vm642_vm2, %v1156_v3  ;;  %1650 = vmatprep.subr.mxu1 %v1693_v33 }
 0x376   : > { %1651 = vmatpush3.msk.msra.mxu1 %vm478_vm4, %v1323_v5  ;;  %1658 = vmatprep.mubr.msk.f32.mxu1 %vm1694_vm5, %v1693_v33 }
 0x377   : > { %1652 = vmatprep.subr.mxu1 %v1693_v33  ;;  %v1321_v6 = vpop.permute.xlu1 %1320 }
 0x378   : > { %1653 = vmatpush3.msk.msra.mxu1 %vm478_vm4, %v1321_v6 }
 0x379   : > { %v1319_v7 = vpop.permute.xlu0 %1318  ;;  %1654 = vmatprep.subr.mxu1 %v1693_v33 }
 0x37a   : > { %1655 = vmatpush3.msk.msra.mxu1 %vm478_vm4, %v1319_v7 }
 0x37b   : > { %1656 = vmatprep.subr.mxu1 %v1693_v33  ;;  %v1317_v9 = vpop.permute.xlu1 %1316 }
 0x37c   : > { %1657 = vmatpush3.msk.msra.mxu1 %vm478_vm4, %v1317_v9 }
 0x37d   : > { %1659 = vmatmul.mubr.msk.f32.vlgmr.msra.gmra.mxu1 %vm642_vm2, %v1315_v8 }
 0x386   : > { %v1406_v18 = vpop.permute.xlu0 %1405 }
 0x3c2   : > { %v1311_v10 = vpop.f32.mrf.mxu0 }
 0x3c4   : > { %v1649_v11 = vpop.f32.mrf.mxu0 }
 0x435   : > { %v1238_v12 = vpop.f32.mrf.mxu1 }
 0x436   : > { %v1312_v14 = vadd.f32 %v1311_v10, %v1238_v12 }
 0x437   : > { %v1638_v13 = vpop.f32.mrf.mxu1 }
 0x43d   : > { %v1397_v15 = vpop.f32.mrf.mxu1 }
 0x43e   : > { %v1401_v16 = vadd.f32 %v1397_v15, %v1312_v14 }
 0x43f   : > { %v1660_v19 = vpop.f32.mrf.mxu1 }
 0x440   : > { %v1408_v20 = vadd.f32 %v1406_v18, %v1401_v16 }
 0x442   : > { %1409 = vst [vmem:[%s462_s28] sm:$0x7] %v1408_v20 }
 0x443 PF: > { %s24_s29 = sadd.s32 1, %s1687_s29  }
 0x444   : > { %p21_p4 = scmp.ge.s32.totalorder %s24_s29, 4  }
 0x446   :  { %23 = sbr.rel (!%p21_p4) target bundleno = 1 (0x1), region = 106 }

</bundles_post_ra>
